<compile_context>
chip_gen: v7x
topology: tpu7x:2x2x1
jax: 0.10.0
libtpu: 0.0.40
codegen_flags: <defaults>
</compile_context>

<pallas_src>
import functools

import jax
import jax.numpy as jnp
from jax.experimental import pallas as pl
from jax.experimental.pallas import tpu as pltpu

LANE = 128  # TPU vreg lane width; the Q head is padded to this for dense stores.


# ----------------------------------------------------------------------------
# Kernel
# ----------------------------------------------------------------------------
def qnet_kernel(x_ref, w1_ref, b1_ref, w2_ref, b2_ref, w3_ref, b3_ref, out_ref):
    # x arrives as f32 and is cast to bf16 in-kernel (VPU cast; avoids an
    # extra wrapper-side HBM pass over the only streaming input).
    x = x_ref[...].astype(w1_ref.dtype)
    # ---- input block: Linear + ReLU (bf16 operands, f32 accumulation) ----
    h1 = jnp.dot(x, w1_ref[...], preferred_element_type=jnp.float32)
    h1 = jnp.maximum(h1 + b1_ref[...], 0.0)
    # ---- hidden block layer 1: Linear + ReLU ----
    h2 = jnp.dot(h1.astype(w2_ref.dtype), w2_ref[...],
                 preferred_element_type=jnp.float32)
    h2 = jnp.maximum(h2 + b2_ref[...], 0.0)
    # ---- hidden block output head: Linear, no activation (lane-padded) ----
    q = jnp.dot(h2.astype(w3_ref.dtype), w3_ref[...],
                preferred_element_type=jnp.float32)
    out_ref[...] = (q + b3_ref[...]).astype(out_ref.dtype)


# ----------------------------------------------------------------------------
# One-time parameter preparation (hoisted out of the per-call forward)
# ----------------------------------------------------------------------------
def prepare_params(params):
    """Cast weights to bf16 and zero-pad the Q head to 128 lanes, once.

    Returns (prepared_arrays, n_actions); pass both to qnetwork_forward.
    """
    w1, b1, w2, b2, w3, b3 = params
    h2, n_act = w3.shape
    n_pad = max(LANE, ((n_act + LANE - 1) // LANE) * LANE)

    w3p = jnp.zeros((h2, n_pad), jnp.bfloat16).at[:, :n_act].set(
        w3.astype(jnp.bfloat16))
    b3p = jnp.zeros((1, n_pad), jnp.float32).at[:, :n_act].set(
        b3.astype(jnp.float32))

    prepared = (
        w1.astype(jnp.bfloat16), b1.astype(jnp.float32),
        w2.astype(jnp.bfloat16), b2.astype(jnp.float32),
        w3p, b3p,
    )
    return jax.block_until_ready(prepared), int(n_act)


# ----------------------------------------------------------------------------
# Forward
# ----------------------------------------------------------------------------
def _num_tensorcores():
    """Heuristic TC-per-chip count (v7x exposes 2 TCs; v5e/v6e have 1)."""
    try:
        kind = jax.devices()[0].device_kind.lower()
    except Exception:  # pragma: no cover - defensive
        return 1
    return 2 if ("v7" in kind or "v4" in kind or "v5p" in kind) else 1


def _choose_tile_b(B, num_tc, max_tile=4096):
    """Batch tile: multiple of 16, 1 grid step on 1-TC chips, >=num_tc on v7x."""
    def round_up16(n):
        return max(16, ((n + 15) // 16) * 16)

    if num_tc > 1:
        tile = round_up16(pl.cdiv(B, num_tc))
    else:
        tile = round_up16(B)
    return min(tile, max_tile)


@functools.partial(jax.jit, static_argnames=("n_act",))
def qnetwork_forward(x, prepared, n_act):
    """Fused 3-layer MLP (QNetwork) forward. x: (B, obs_dim) float32."""
    w1b, b1f, w2b, b2f, w3p, b3p = prepared
    B, obs_dim = x.shape
    h1 = w1b.shape[1]
    h2 = w2b.shape[1]
    n_pad = w3p.shape[1]

    tile_b = _choose_tile_b(B, _num_tensorcores())
    grid = (pl.cdiv(B, tile_b),)

    q_padded = pl.pallas_call(
        qnet_kernel,
        out_shape=jax.ShapeDtypeStruct((B, n_pad), jnp.float32),
        grid_spec=pltpu.PrefetchScalarGridSpec(
            num_scalar_prefetch=0,
            grid=grid,
            in_specs=[
                pl.BlockSpec((tile_b, obs_dim), lambda i: (i, 0)),  # x (streams, f32)
                pl.BlockSpec((obs_dim, h1), lambda i: (0, 0)),      # W1^T (resident)
                pl.BlockSpec((1, h1), lambda i: (0, 0)),            # b1
                pl.BlockSpec((h1, h2), lambda i: (0, 0)),           # W2^T
                pl.BlockSpec((1, h2), lambda i: (0, 0)),            # b2
                pl.BlockSpec((h2, n_pad), lambda i: (0, 0)),        # W3^T (padded)
                pl.BlockSpec((1, n_pad), lambda i: (0, 0)),         # b3 (padded)
            ],
            out_specs=pl.BlockSpec((tile_b, n_pad), lambda i: (i, 0)),
        ),
        compiler_params=pltpu.CompilerParams(
            dimension_semantics=("parallel",),     # batch axis shards across TCs
            vmem_limit_bytes=32 * 1024 * 1024,     # safe on v7x's 64 MiB VMEM
        ),
    )(x, w1b, b1f, w2b, b2f, w3p, b3p)

    # Padded columns are exact zeros; real Q-values are the first n_act lanes.
    return q_padded[:, :n_act]


# ----------------------------------------------------------------------------
# Init + reference
# ----------------------------------------------------------------------------
def init_params(key, obs_dim, h1, h2, n_actions):
    """Deterministic synthetic init (uniform, PyTorch-Linear-like scale).

    Returns weights already transposed to (in, out) for the kernel.
    """
    ks = jax.random.split(key, 6)

    def lin(kw, kb, fan_in, fan_out):
        bound = 1.0 / jnp.sqrt(fan_in)
        w = jax.random.uniform(kw, (fan_in, fan_out), jnp.float32, -bound, bound)
        b = jax.random.uniform(kb, (1, fan_out), jnp.float32, -bound, bound)
        return w, b

    w1, b1 = lin(ks[0], ks[1], obs_dim, h1)
    w2, b2 = lin(ks[2], ks[3], h1, h2)
    w3, b3 = lin(ks[4], ks[5], h2, n_actions)
    return (w1, b1, w2, b2, w3, b3)


def reference_forward(x, params):
    w1, b1, w2, b2, w3, b3 = params
    h = jnp.maximum(x @ w1 + b1, 0.0)
    h = jnp.maximum(h @ w2 + b2, 0.0)
    return h @ w3 + b3


if __name__ == "__main__":
    # Vector-observation DQN shapes: small obs/MLP, modest replay-style batch.
    B, OBS_DIM, H1, H2, N_ACTIONS = 256, 16, 32, 32, 4

    key = jax.random.PRNGKey(0)
    kx, kp = jax.random.split(key)
    x = jax.random.normal(kx, (B, OBS_DIM), dtype=jnp.float32)
    params = init_params(kp, OBS_DIM, H1, H2, N_ACTIONS)

    # One-time prep: bf16 weight casts + head padding happen here, not per call.
    prepared, n_act = prepare_params(params)

    q = qnetwork_forward(x, prepared, n_act)
    q = jax.block_until_ready(q)

    q_ref = reference_forward(x, params)
    assert q.shape == (B, N_ACTIONS)
    # bf16 operands with f32 accumulation -> loosened tolerance vs f32 reference.
    max_err = float(jnp.max(jnp.abs(q - q_ref)))
    assert jnp.allclose(q, q_ref, atol=2e-2, rtol=2e-2), max_err

    print("KERNEL_OK")
</pallas_src>

<mosaic_0001>
module attributes {stable_mosaic.version = 11 : i64} {
  func.func @qnet_kernel(%arg0: i32, %arg1: memref<256x16xf32, #tpu.memory_space<vmem>>, %arg2: memref<16x32xbf16, #tpu.memory_space<vmem>>, %arg3: memref<1x32xf32, #tpu.memory_space<vmem>>, %arg4: memref<32x32xbf16, #tpu.memory_space<vmem>>, %arg5: memref<1x32xf32, #tpu.memory_space<vmem>>, %arg6: memref<32x128xbf16, #tpu.memory_space<vmem>>, %arg7: memref<1x128xf32, #tpu.memory_space<vmem>>, %arg8: memref<256x128xf32, #tpu.memory_space<vmem>>) attributes {dimension_semantics = [#tpu.dimension_semantics<parallel>], iteration_bounds = array<i64: 1>, scalar_prefetch = 0 : i64, scratch_operands = 0 : i64, tpu.core_type = #tpu.core_type<tc>, window_params = [{transform_indices = @transform_0, window_bounds = array<i64: 256, 16>}, {pipeline_mode = #tpu.pipeline_mode<synchronous>, transform_indices = @transform_1, window_bounds = array<i64: 16, 32>}, {pipeline_mode = #tpu.pipeline_mode<synchronous>, transform_indices = @transform_2, window_bounds = array<i64: 1, 32>}, {pipeline_mode = #tpu.pipeline_mode<synchronous>, transform_indices = @transform_3, window_bounds = array<i64: 32, 32>}, {pipeline_mode = #tpu.pipeline_mode<synchronous>, transform_indices = @transform_4, window_bounds = array<i64: 1, 32>}, {pipeline_mode = #tpu.pipeline_mode<synchronous>, transform_indices = @transform_5, window_bounds = array<i64: 32, 128>}, {pipeline_mode = #tpu.pipeline_mode<synchronous>, transform_indices = @transform_6, window_bounds = array<i64: 1, 128>}, {transform_indices = @transform_7, window_bounds = array<i64: 256, 128>}]} {
    %c0 = arith.constant 0 : index
    %c0_0 = arith.constant 0 : index
    %0 = vector.load %arg1[%c0, %c0_0] : memref<256x16xf32, #tpu.memory_space<vmem>>, vector<256x16xf32>
    %1 = arith.truncf %0 : vector<256x16xf32> to vector<256x16xbf16>
    %c0_1 = arith.constant 0 : index
    %c0_2 = arith.constant 0 : index
    %2 = vector.load %arg2[%c0_1, %c0_2] : memref<16x32xbf16, #tpu.memory_space<vmem>>, vector<16x32xbf16>
    %cst = arith.constant dense<0.000000e+00> : vector<256x32xf32>
    %3 = tpu.matmul %1, %2, %cst {dimension_numbers = #tpu.dot_dimension_numbers<[1], [0], [0], [1], [0, 0, 1, 1], [], []>} : vector<256x16xbf16>, vector<16x32xbf16>, vector<256x32xf32> -> vector<256x32xf32>
    %c0_3 = arith.constant 0 : index
    %c0_4 = arith.constant 0 : index
    %4 = vector.load %arg3[%c0_3, %c0_4] : memref<1x32xf32, #tpu.memory_space<vmem>>, vector<1x32xf32>
    %5 = vector.broadcast %4 : vector<1x32xf32> to vector<256x32xf32>
    %6 = arith.addf %3, %5 : vector<256x32xf32>
    %cst_5 = arith.constant 0.000000e+00 : f32
    %7 = vector.broadcast %cst_5 : f32 to vector<256x32xf32>
    %8 = arith.maximumf %6, %7 : vector<256x32xf32>
    %9 = arith.truncf %8 : vector<256x32xf32> to vector<256x32xbf16>
    %c0_6 = arith.constant 0 : index
    %c0_7 = arith.constant 0 : index
    %10 = vector.load %arg4[%c0_6, %c0_7] : memref<32x32xbf16, #tpu.memory_space<vmem>>, vector<32x32xbf16>
    %cst_8 = arith.constant dense<0.000000e+00> : vector<256x32xf32>
    %11 = tpu.matmul %9, %10, %cst_8 {dimension_numbers = #tpu.dot_dimension_numbers<[1], [0], [0], [1], [0, 0, 1, 1], [], []>} : vector<256x32xbf16>, vector<32x32xbf16>, vector<256x32xf32> -> vector<256x32xf32>
    %c0_9 = arith.constant 0 : index
    %c0_10 = arith.constant 0 : index
    %12 = vector.load %arg5[%c0_9, %c0_10] : memref<1x32xf32, #tpu.memory_space<vmem>>, vector<1x32xf32>
    %13 = vector.broadcast %12 : vector<1x32xf32> to vector<256x32xf32>
    %14 = arith.addf %11, %13 : vector<256x32xf32>
    %cst_11 = arith.constant 0.000000e+00 : f32
    %15 = vector.broadcast %cst_11 : f32 to vector<256x32xf32>
    %16 = arith.maximumf %14, %15 : vector<256x32xf32>
    %17 = arith.truncf %16 : vector<256x32xf32> to vector<256x32xbf16>
    %c0_12 = arith.constant 0 : index
    %c0_13 = arith.constant 0 : index
    %18 = vector.load %arg6[%c0_12, %c0_13] : memref<32x128xbf16, #tpu.memory_space<vmem>>, vector<32x128xbf16>
    %cst_14 = arith.constant dense<0.000000e+00> : vector<256x128xf32>
    %19 = tpu.matmul %17, %18, %cst_14 {dimension_numbers = #tpu.dot_dimension_numbers<[1], [0], [0], [1], [0, 0, 1, 1], [], []>} : vector<256x32xbf16>, vector<32x128xbf16>, vector<256x128xf32> -> vector<256x128xf32>
    %c0_15 = arith.constant 0 : index
    %c0_16 = arith.constant 0 : index
    %20 = vector.load %arg7[%c0_15, %c0_16] : memref<1x128xf32, #tpu.memory_space<vmem>>, vector<1x128xf32>
    %21 = vector.broadcast %20 : vector<1x128xf32> to vector<256x128xf32>
    %22 = arith.addf %19, %21 : vector<256x128xf32>
    %c0_17 = arith.constant 0 : index
    %c0_18 = arith.constant 0 : index
    %23 = vector.load %arg8[%c0_17, %c0_18] : memref<256x128xf32, #tpu.memory_space<vmem>>, vector<256x128xf32>
    tpu.vector_store %arg8[%c0_17, %c0_18], %22 {strides = array<i32>} : memref<256x128xf32, #tpu.memory_space<vmem>>, vector<256x128xf32>,
    return
  }
  func.func @transform_0(%arg0: i32) -> (i32, i32) {
    %c0_i32 = arith.constant 0 : i32
    %c0_i32_0 = arith.constant 0 : i32
    return %arg0, %c0_i32 : i32, i32
  }
  func.func @transform_1(%arg0: i32) -> (i32, i32) {
    %c0_i32 = arith.constant 0 : i32
    %c0_i32_0 = arith.constant 0 : i32
    %c0_i32_1 = arith.constant 0 : i32
    return %c0_i32, %c0_i32_0 : i32, i32
  }
  func.func @transform_2(%arg0: i32) -> (i32, i32) {
    %c0_i32 = arith.constant 0 : i32
    %c0_i32_0 = arith.constant 0 : i32
    %c0_i32_1 = arith.constant 0 : i32
    return %c0_i32, %c0_i32_0 : i32, i32
  }
  func.func @transform_3(%arg0: i32) -> (i32, i32) {
    %c0_i32 = arith.constant 0 : i32
    %c0_i32_0 = arith.constant 0 : i32
    %c0_i32_1 = arith.constant 0 : i32
    return %c0_i32, %c0_i32_0 : i32, i32
  }
  func.func @transform_4(%arg0: i32) -> (i32, i32) {
    %c0_i32 = arith.constant 0 : i32
    %c0_i32_0 = arith.constant 0 : i32
    %c0_i32_1 = arith.constant 0 : i32
    return %c0_i32, %c0_i32_0 : i32, i32
  }
  func.func @transform_5(%arg0: i32) -> (i32, i32) {
    %c0_i32 = arith.constant 0 : i32
    %c0_i32_0 = arith.constant 0 : i32
    %c0_i32_1 = arith.constant 0 : i32
    return %c0_i32, %c0_i32_0 : i32, i32
  }
  func.func @transform_6(%arg0: i32) -> (i32, i32) {
    %c0_i32 = arith.constant 0 : i32
    %c0_i32_0 = arith.constant 0 : i32
    %c0_i32_1 = arith.constant 0 : i32
    return %c0_i32, %c0_i32_0 : i32, i32
  }
  func.func @transform_7(%arg0: i32) -> (i32, i32) {
    %c0_i32 = arith.constant 0 : i32
    %c0_i32_0 = arith.constant 0 : i32
    return %arg0, %c0_i32 : i32, i32
  }
}

</mosaic_0001>

<bundles_post_ra>
// kernel: qnetwork_forward.1
= control target key start
LH: loop header
LB: loop body
LE: loop exit
PB: predicated region body
PF: predicated region fallthrough
CT: control target
= control target key end

     0   :  { %vm90_vm0 = vcmask 130048   ;;  %vm371_vm1 = vcmask 261120   ;;  %s1531_s1 = inlined_call_operand.vmem [shape: bf16[16,32], index: 1, kind: input, shape index: {}]   ;;  %s1532_s0 = inlined_call_operand.vmem [shape: f32[256,16], index: 0, kind: input, shape index: {}]   ;;  %s1533_s3 = inlined_call_operand.vmem [shape: bf16[32,32], index: 3, kind: input, shape index: {}]   ;;  %s1534_s5 = inlined_call_operand.vmem [shape: bf16[32,128], index: 5, kind: input, shape index: {}]   ;;  %s1535_s2 = inlined_call_operand.vmem [shape: f32[1,32], index: 2, kind: input, shape index: {}]   ;;  %s1536_s4 = inlined_call_operand.vmem [shape: f32[1,32], index: 4, kind: input, shape index: {}]   ;;  %s1537_s6 = inlined_call_operand.vmem [shape: f32[1,128], index: 6, kind: input, shape index: {}]   ;;  %s1538_s7 = inlined_call_operand.vmem [shape: f32[256,128], index: 7, kind: output, shape index: {}]  }
   0x1   :  { %v1114_v0 = vld [vmem:[%s1531_s1] sm:$0xff]   ;;  %v28_v2 = vld [vmem:[%s1532_s0 + $0x8] sm:$0xff]  ;;  %v29_v3 = vld [vmem:[%s1532_s0 + $0x10] sm:$0xff] }
   0x2   :  { %v27_v1 = vld [vmem:[%s1532_s0] sm:$0xff]  ;;  %1006 = vmatprep.subr.bf16.mxu0 %v1114_v0  ;;  %v30_v5 = vld [vmem:[%s1532_s0 + $0x18] sm:$0xff]  ;;  %v32_v7 = vld [vmem:[%s1532_s0 + $0x28] sm:$0xff]  ;;  %1112 = vmatprep.subr.bf16.mxu1 %v1114_v0 }
   0x3   :  { %v59_v4 = vpack.c.bf16 %v28_v2, %v27_v1  ;;  %v31_v6 = vld [vmem:[%s1532_s0 + $0x20] sm:$0xff]  ;;  %1007 = vmatpush3.bf16.msra.mxu0 %v1114_v0  ;;  %v60_v8 = vpack.c.bf16 %v30_v5, %v29_v3  ;;  %1113 = vmatpush3.bf16.msra.mxu1 %v1114_v0  ;;  %v33_v10 = vld [vmem:[%s1532_s0 + $0x30] sm:$0xff]  ;;  %v34_v11 = vld [vmem:[%s1532_s0 + $0x38] sm:$0xff] }
   0x4   :  { %v61_v9 = vpack.c.bf16 %v32_v7, %v31_v6  ;;  %v43_v12 = vld [vmem:[%s1532_s0 + $0x80] sm:$0xff]  ;;  %v44_v13 = vld [vmem:[%s1532_s0 + $0x88] sm:$0xff]  ;;  %v45_v15 = vld [vmem:[%s1532_s0 + $0x90] sm:$0xff]  ;;  %v62_v23 = vpack.c.bf16 %v34_v11, %v33_v10 }
   0x5   :  { %1008 = vmatprep.mubr.msk.bf16.mxu0 %vm90_vm0, %v59_v4  ;;  %v67_v14 = vpack.c.bf16 %v44_v13, %v43_v12  ;;  %v46_v16 = vld [vmem:[%s1532_s0 + $0x98] sm:$0xff]  ;;  %v47_v17 = vld [vmem:[%s1532_s0 + $0xa0] sm:$0xff]  ;;  %v36_v19 = vld [vmem:[%s1532_s0 + $0x48] sm:$0xff] }
   0x6   :  { %1009 = vmatmul.mubr.msk.bf16.vlgmr.msra.gmra.mrb[0].mxu0 %vm90_vm0, %v60_v8  ;;  %v35_v18 = vld [vmem:[%s1532_s0 + $0x40] sm:$0xff]  ;;  %v68_v20 = vpack.c.bf16 %v46_v16, %v45_v15  ;;  %v48_v21 = vld [vmem:[%s1532_s0 + $0xa8] sm:$0xff]  ;;  %v49_v24 = vld [vmem:[%s1532_s0 + $0xb0] sm:$0xff] }
   0x7   :  { %1012 = vmatprep.mubr.msk.bf16.mxu0 %vm90_vm0, %v61_v9  ;;  %1024 = vmatprep.mubr.msk.bf16.mxu1 %vm90_vm0, %v67_v14  ;;  %v69_v22 = vpack.c.bf16 %v48_v21, %v47_v17  ;;  %v50_v25 = vld [vmem:[%s1532_s0 + $0xb8] sm:$0xff]  ;;  %v63_v26 = vpack.c.bf16 %v36_v19, %v35_v18  ;;  %v51_v27 = vld [vmem:[%s1532_s0 + $0xc0] sm:$0xff]  ;;  %v52_v28 = vld [vmem:[%s1532_s0 + $0xc8] sm:$0xff] }
   0x8   :  { %1025 = vmatmul.mubr.msk.bf16.vlgmr.msra.gmra.mrb[0].mxu1 %vm90_vm0, %v68_v20  ;;  %v1115_v29 = vld [vmem:[%s1533_s3] sm:$0xff]   ;;  %v1116_v30 = vld [vmem:[%s1533_s3 + $0x8] sm:$0xff]   ;;  %v70_v31 = vpack.c.bf16 %v50_v25, %v49_v24  ;;  %v37_v32 = vld [vmem:[%s1532_s0 + $0x50] sm:$0xff]  ;;  %v71_v34 = vpack.c.bf16 %v52_v28, %v51_v27 }
   0x9   :  { %1028 = vmatprep.mubr.msk.bf16.mxu1 %vm90_vm0, %v69_v22  ;;  %1040 = vmatprep.subr.bf16.mxu1 %v1115_v29  ;;  %v38_v33 = vld [vmem:[%s1532_s0 + $0x58] sm:$0xff]  ;;  %v39_v35 = vld [vmem:[%s1532_s0 + $0x60] sm:$0xff]  ;;  %v40_v36 = vld [vmem:[%s1532_s0 + $0x68] sm:$0xff] }
   0xa   :  { %1041 = vmatpush3.bf16.msra.mxu1 %v1115_v29  ;;  %v64_v37 = vpack.c.bf16 %v38_v33, %v37_v32  ;;  %v65_v38 = vpack.c.bf16 %v40_v36, %v39_v35  ;;  %v53_v39 = vld [vmem:[%s1532_s0 + $0xd0] sm:$0xff]  ;;  %v54_v40 = vld [vmem:[%s1532_s0 + $0xd8] sm:$0xff]  ;;  %v55_v41 = vld [vmem:[%s1532_s0 + $0xe0] sm:$0xff] }
   0xb   :  { %1042 = vmatprep.subr.bf16.mxu1 %v1116_v30  ;;  %v56_v42 = vld [vmem:[%s1532_s0 + $0xe8] sm:$0xff]  ;;  %v72_v43 = vpack.c.bf16 %v54_v40, %v53_v39  ;;  %v41_v44 = vld [vmem:[%s1532_s0 + $0x70] sm:$0xff]  ;;  %v42_v45 = vld [vmem:[%s1532_s0 + $0x78] sm:$0xff] }
   0xc   :  { %v73_v46 = vpack.c.bf16 %v56_v42, %v55_v41  ;;  %v66_v47 = vpack.c.bf16 %v42_v45, %v41_v44  ;;  %v57_v48 = vld [vmem:[%s1532_s0 + $0xf0] sm:$0xff]  ;;  %v58_v49 = vld [vmem:[%s1532_s0 + $0xf8] sm:$0xff]  ;;  %v1117_v51 = vld [vmem:[%s1534_s5] sm:$0xff]  }
   0xd   :  { %v74_v50 = vpack.c.bf16 %v58_v49, %v57_v48  ;;  %v1118_v52 = vld [vmem:[%s1534_s5 + $0x8] sm:$0xff]   ;;  %1076 = vmatprep.subr.bf16.mxu0 %v1117_v51  ;;  %v1289_v53 = vld [vmem:[%s1535_s2] ss:$0 sm:$0xff] }
   0xe   :  { %1013 = vmatmul.mubr.msk.bf16.gmra.mrb[4].mxu0 %vm90_vm0, %v62_v23  ;;  %1043 = vmatpush3.bf16.msra.mxu1 %v1116_v30 }
   0xf   :  { %1016 = vmatprep.mubr.msk.bf16.mxu0 %vm90_vm0, %v63_v26  ;;  %1077 = vmatpush3.bf16.msra.mxu0 %v1117_v51 }
  0x10   :  { %1029 = vmatmul.mubr.msk.bf16.gmra.mrb[4].mxu1 %vm90_vm0, %v70_v31  ;;  %1078 = vmatprep.subr.bf16.mxu0 %v1118_v52 }
  0x11   :  { %1032 = vmatprep.mubr.msk.bf16.mxu1 %vm90_vm0, %v71_v34 }
  0x13   :  { %1079 = vmatpush3.bf16.msra.mxu0 %v1118_v52 }
  0x16   :  { %1017 = vmatmul.mubr.msk.bf16.gmra.mrb[8].mxu0 %vm90_vm0, %v64_v37 }
  0x17   :  { %1020 = vmatprep.mubr.msk.bf16.mxu0 %vm90_vm0, %v65_v38 }
  0x18   :  { %1033 = vmatmul.mubr.msk.bf16.gmra.mrb[8].mxu1 %vm90_vm0, %v72_v43 }
  0x19   :  { %1036 = vmatprep.mubr.msk.bf16.mxu1 %vm90_vm0, %v73_v46 }
  0x1e   :  { %1021 = vmatmul.mubr.msk.bf16.gmra.mrb[12].mxu0 %vm90_vm0, %v66_v47 }
  0x20   :  { %1037 = vmatmul.mubr.msk.bf16.gmra.mrb[12].mxu1 %vm90_vm0, %v74_v50 }
  0xd9   :  { %v1010_v54 = vpop.f32.mrb[0].mxu0 }
  0xda   :  { %v182_v55 = vadd.f32 %v1010_v54, %v1289_v53  ;;  %v173_v56 = vpop.f32.mrb[1].mxu0 }
  0xdb   :  { %v174_v57 = vadd.f32 %v1289_v53, %v173_v56  ;;  %v1011_v58 = vpop.f32.mrb[2].mxu0  ;;  %v1026_v62 = vpop.f32.mrb[0].mxu1 }
  0xdc   :  { %v185_v59 = vadd.f32 %v1011_v58, %v1289_v53  ;;  %v176_v60 = vpop.f32.mrb[3].mxu0  ;;  %v302_v63 = vmax.f32 %v182_v55, 0.0  ;;  %v246_v1 = vadd.f32 %v1026_v62, %v1289_v53  ;;  %v237_v2 = vpop.f32.mrb[1].mxu1 }
  0xdd   :  { %v177_v61 = vadd.f32 %v1289_v53, %v176_v60  ;;  %v300_v3 = vmax.f32 %v174_v57, 0.0  ;;  %v238_v5 = vadd.f32 %v1289_v53, %v237_v2  ;;  %v1027_v6 = vpop.f32.mrb[2].mxu1 }
  0xde   :  { %v303_v0 = vmax.f32 %v185_v59, 0.0  ;;  %v318_v8 = vmax.f32 %v246_v1, 0.0  ;;  %v249_v9 = vadd.f32 %v1027_v6, %v1289_v53  ;;  %v240_v10 = vpop.f32.mrb[3].mxu1 }
  0xdf   :  { %v301_v4 = vmax.f32 %v177_v61, 0.0  ;;  %v316_v13 = vmax.f32 %v238_v5, 0.0  ;;  %v241_v14 = vadd.f32 %v1289_v53, %v240_v10 }
  0xe0   :  { %v333_v7 = vpack.c.bf16 %v303_v0, %v302_v63  ;;  %v319_v17 = vmax.f32 %v249_v9, 0.0 }
  0xe1   :  { %v332_v11 = vpack.c.bf16 %v301_v4, %v300_v3  ;;  %v1014_v12 = vpop.f32.mrb[4].mxu0  ;;  %v317_v20 = vmax.f32 %v241_v14, 0.0 }
  0xe2   :  { %v198_v15 = vadd.f32 %v1014_v12, %v1289_v53  ;;  %v189_v16 = vpop.f32.mrb[5].mxu0  ;;  %v1304_v23 = vpack.c.bf16 %v319_v17, %v318_v8 }
  0xe3   :  { %v190_v18 = vadd.f32 %v1289_v53, %v189_v16  ;;  %v1015_v19 = vpop.f32.mrb[6].mxu0  ;;  %1044 = vmatprep.mubr.msk.bf16.mxu1 %vm371_vm1, %v332_v11  ;;  %v1307_v25 = vpack.c.bf16 %v317_v20, %v316_v13  ;;  %v1030_v26 = vpop.f32.mrb[4].mxu1 }
  0xe4   :  { %v201_v21 = vadd.f32 %v1015_v19, %v1289_v53  ;;  %v192_v22 = vpop.f32.mrb[7].mxu0  ;;  %1045 = vmatmul.mubr.msk.bf16.vlgmr.msra.gmra.mrb[16].mxu1 %vm371_vm1, %v333_v7  ;;  %v306_v27 = vmax.f32 %v198_v15, 0.0  ;;  %v262_v29 = vadd.f32 %v1030_v26, %v1289_v53  ;;  %v253_v30 = vpop.f32.mrb[5].mxu1 }
  0xe5   :  { %v193_v24 = vadd.f32 %v1289_v53, %v192_v22  ;;  %v304_v31 = vmax.f32 %v190_v18, 0.0  ;;  %v254_v33 = vadd.f32 %v1289_v53, %v253_v30  ;;  %v1031_v34 = vpop.f32.mrb[6].mxu1 }
  0xe6   :  { %v307_v28 = vmax.f32 %v201_v21, 0.0  ;;  %v322_v36 = vmax.f32 %v262_v29, 0.0  ;;  %v265_v37 = vadd.f32 %v1031_v34, %v1289_v53  ;;  %v256_v38 = vpop.f32.mrb[7].mxu1 }
  0xe7   :  { %v305_v32 = vmax.f32 %v193_v24, 0.0  ;;  %v320_v41 = vmax.f32 %v254_v33, 0.0  ;;  %v257_v42 = vadd.f32 %v1289_v53, %v256_v38 }
  0xe8   :  { %v335_v35 = vpack.c.bf16 %v307_v28, %v306_v27  ;;  %v323_v45 = vmax.f32 %v265_v37, 0.0 }
  0xe9   :  { %v334_v39 = vpack.c.bf16 %v305_v32, %v304_v31  ;;  %v1018_v40 = vpop.f32.mrb[8].mxu0  ;;  %v321_v48 = vmax.f32 %v257_v42, 0.0 }
  0xea   :  { %v214_v43 = vadd.f32 %v1018_v40, %v1289_v53  ;;  %v205_v44 = vpop.f32.mrb[9].mxu0  ;;  %v343_v51 = vpack.c.bf16 %v323_v45, %v322_v36 }
  0xeb   :  { %v206_v46 = vadd.f32 %v1289_v53, %v205_v44  ;;  %v1019_v47 = vpop.f32.mrb[10].mxu0  ;;  %1048 = vmatprep.mubr.msk.bf16.mxu1 %vm371_vm1, %v334_v39  ;;  %v342_v54 = vpack.c.bf16 %v321_v48, %v320_v41  ;;  %v1034_v55 = vpop.f32.mrb[8].mxu1 }
  0xec   :  { %v217_v49 = vadd.f32 %v1019_v47, %v1289_v53  ;;  %v208_v50 = vpop.f32.mrb[11].mxu0  ;;  %1049 = vmatmul.mubr.msk.bf16.gmra.mrb[20].mxu1 %vm371_vm1, %v335_v35  ;;  %v310_v56 = vmax.f32 %v214_v43, 0.0  ;;  %v278_v58 = vadd.f32 %v1034_v55, %v1289_v53  ;;  %v269_v59 = vpop.f32.mrb[9].mxu1 }
  0xed   :  { %v209_v52 = vadd.f32 %v1289_v53, %v208_v50  ;;  %v308_v60 = vmax.f32 %v206_v46, 0.0  ;;  %v270_v62 = vadd.f32 %v1289_v53, %v269_v59  ;;  %v1035_v63 = vpop.f32.mrb[10].mxu1 }
  0xee   :  { %v311_v57 = vmax.f32 %v217_v49, 0.0  ;;  %v326_v1 = vmax.f32 %v278_v58, 0.0  ;;  %v281_v2 = vadd.f32 %v1035_v63, %v1289_v53  ;;  %v272_v3 = vpop.f32.mrb[11].mxu1 }
  0xef   :  { %v309_v61 = vmax.f32 %v209_v52, 0.0  ;;  %v324_v6 = vmax.f32 %v270_v62, 0.0  ;;  %v273_v7 = vadd.f32 %v1289_v53, %v272_v3 }
  0xf0   :  { %v337_v0 = vpack.c.bf16 %v311_v57, %v310_v56  ;;  %v327_v10 = vmax.f32 %v281_v2, 0.0 }
  0xf1   :  { %v336_v4 = vpack.c.bf16 %v309_v61, %v308_v60  ;;  %v1022_v5 = vpop.f32.mrb[12].mxu0  ;;  %v325_v13 = vmax.f32 %v273_v7, 0.0 }
  0xf2   :  { %v230_v8 = vadd.f32 %v1022_v5, %v1289_v53  ;;  %v221_v9 = vpop.f32.mrb[13].mxu0  ;;  %v345_v16 = vpack.c.bf16 %v327_v10, %v326_v1 }
  0xf3   :  { %v222_v11 = vadd.f32 %v1289_v53, %v221_v9  ;;  %v1023_v12 = vpop.f32.mrb[14].mxu0  ;;  %1052 = vmatprep.mubr.msk.bf16.mxu1 %vm371_vm1, %v336_v4  ;;  %v344_v18 = vpack.c.bf16 %v325_v13, %v324_v6  ;;  %v1038_v19 = vpop.f32.mrb[12].mxu1 }
  0xf4   :  { %v233_v14 = vadd.f32 %v1023_v12, %v1289_v53  ;;  %v224_v15 = vpop.f32.mrb[15].mxu0  ;;  %1053 = vmatmul.mubr.msk.bf16.gmra.mrb[24].mxu1 %vm371_vm1, %v337_v0  ;;  %v314_v20 = vmax.f32 %v230_v8, 0.0  ;;  %v294_v22 = vadd.f32 %v1038_v19, %v1289_v53  ;;  %v285_v24 = vpop.f32.mrb[13].mxu1 }
  0xf5   :  { %v225_v17 = vadd.f32 %v1289_v53, %v224_v15  ;;  %v312_v26 = vmax.f32 %v222_v11, 0.0  ;;  %v286_v28 = vadd.f32 %v1289_v53, %v285_v24  ;;  %v1039_v29 = vpop.f32.mrb[14].mxu1 }
  0xf6   :  { %v315_v21 = vmax.f32 %v233_v14, 0.0  ;;  %v330_v31 = vmax.f32 %v294_v22, 0.0  ;;  %v297_v32 = vadd.f32 %v1039_v29, %v1289_v53  ;;  %v288_v33 = vpop.f32.mrb[15].mxu1 }
  0xf7   :  { %v313_v27 = vmax.f32 %v225_v17, 0.0  ;;  %v328_v35 = vmax.f32 %v286_v28, 0.0  ;;  %v289_v36 = vadd.f32 %v1289_v53, %v288_v33  ;;  %v1348_v53 = vld [vmem:[%s1536_s4] ss:$0 sm:$0xff] }
  0xf8   :  { %v339_v30 = vpack.c.bf16 %v315_v21, %v314_v20  ;;  %v331_v37 = vmax.f32 %v297_v32, 0.0 }
  0xf9   :  { %v338_v34 = vpack.c.bf16 %v313_v27, %v312_v26  ;;  %v329_v38 = vmax.f32 %v289_v36, 0.0 }
  0xfa   :  { %v347_v39 = vpack.c.bf16 %v331_v37, %v330_v31 }
  0xfb   :  { %1056 = vmatprep.mubr.msk.bf16.mxu1 %vm371_vm1, %v338_v34  ;;  %v346_v40 = vpack.c.bf16 %v329_v38, %v328_v35 }
  0xfc   :  { %1057 = vmatmul.mubr.msk.bf16.gmra.mrb[28].mxu1 %vm371_vm1, %v339_v30 }
  0xfd   :  { %1060 = vmatprep.mubr.msk.bf16.mxu1 %vm371_vm1, %v1307_v25 }
 0x104   :  { %1061 = vmatmul.mubr.msk.bf16.gmra.mrb[32].mxu1 %vm371_vm1, %v1304_v23 }
 0x105   :  { %1064 = vmatprep.mubr.msk.bf16.mxu1 %vm371_vm1, %v342_v54 }
 0x10c   :  { %1065 = vmatmul.mubr.msk.bf16.gmra.mrb[36].mxu1 %vm371_vm1, %v343_v51 }
 0x10d   :  { %1068 = vmatprep.mubr.msk.bf16.mxu1 %vm371_vm1, %v344_v18 }
 0x114   :  { %1069 = vmatmul.mubr.msk.bf16.gmra.mrb[40].mxu1 %vm371_vm1, %v345_v16 }
 0x115   :  { %1072 = vmatprep.mubr.msk.bf16.mxu1 %vm371_vm1, %v346_v40 }
 0x11c   :  { %1073 = vmatmul.mubr.msk.bf16.gmra.mrb[44].mxu1 %vm371_vm1, %v347_v39 }
 0x1b7   :  { %v1046_v25 = vpop.f32.mrb[16].mxu1 }
 0x1b8   :  { %v463_v23 = vadd.f32 %v1046_v25, %v1348_v53  ;;  %v454_v41 = vpop.f32.mrb[17].mxu1 }
 0x1b9   :  { %v455_v42 = vadd.f32 %v1348_v53, %v454_v41  ;;  %v1047_v43 = vpop.f32.mrb[18].mxu1 }
 0x1ba   :  { %v466_v44 = vadd.f32 %v1047_v43, %v1348_v53  ;;  %v457_v45 = vpop.f32.mrb[19].mxu1  ;;  %v583_v47 = vmax.f32 %v463_v23, 0.0 }
 0x1bb   :  { %v458_v46 = vadd.f32 %v1348_v53, %v457_v45  ;;  %v581_v49 = vmax.f32 %v455_v42, 0.0 }
 0x1bc   :  { %v584_v48 = vmax.f32 %v466_v44, 0.0 }
 0x1bd   :  { %v582_v50 = vmax.f32 %v458_v46, 0.0 }
 0x1be   :  { %v614_v51 = vpack.c.bf16 %v584_v48, %v583_v47 }
 0x1bf   :  { %v613_v52 = vpack.c.bf16 %v582_v50, %v581_v49  ;;  %v1050_v54 = vpop.f32.mrb[20].mxu1 }
 0x1c0   :  { %v479_v55 = vadd.f32 %v1050_v54, %v1348_v53  ;;  %v470_v56 = vpop.f32.mrb[21].mxu1 }
 0x1c1   :  { %v471_v57 = vadd.f32 %v1348_v53, %v470_v56  ;;  %v1051_v58 = vpop.f32.mrb[22].mxu1  ;;  %1080 = vmatprep.mubr.msk.bf16.mxu0 %vm371_vm1, %v613_v52 }
 0x1c2   :  { %v482_v59 = vadd.f32 %v1051_v58, %v1348_v53  ;;  %v473_v60 = vpop.f32.mrb[23].mxu1  ;;  %1081 = vmatmul.mubr.msk.bf16.vlgmr.msra.gmra.mrb[16].mxu0 %vm371_vm1, %v614_v51  ;;  %v587_v62 = vmax.f32 %v479_v55, 0.0 }
 0x1c3   :  { %v474_v61 = vadd.f32 %v1348_v53, %v473_v60  ;;  %v585_v0 = vmax.f32 %v471_v57, 0.0 }
 0x1c4   :  { %v588_v63 = vmax.f32 %v482_v59, 0.0 }
 0x1c5   :  { %v586_v1 = vmax.f32 %v474_v61, 0.0 }
 0x1c6   :  { %v616_v2 = vpack.c.bf16 %v588_v63, %v587_v62 }
 0x1c7   :  { %v615_v3 = vpack.c.bf16 %v586_v1, %v585_v0  ;;  %v1054_v4 = vpop.f32.mrb[24].mxu1 }
 0x1c8   :  { %v495_v5 = vadd.f32 %v1054_v4, %v1348_v53  ;;  %v486_v6 = vpop.f32.mrb[25].mxu1 }
 0x1c9   :  { %v487_v7 = vadd.f32 %v1348_v53, %v486_v6  ;;  %v1055_v8 = vpop.f32.mrb[26].mxu1  ;;  %1084 = vmatprep.mubr.msk.bf16.mxu0 %vm371_vm1, %v615_v3 }
 0x1ca   :  { %v498_v9 = vadd.f32 %v1055_v8, %v1348_v53  ;;  %v489_v10 = vpop.f32.mrb[27].mxu1  ;;  %1085 = vmatmul.mubr.msk.bf16.gmra.mrb[20].mxu0 %vm371_vm1, %v616_v2  ;;  %v591_v12 = vmax.f32 %v495_v5, 0.0 }
 0x1cb   :  { %v490_v11 = vadd.f32 %v1348_v53, %v489_v10  ;;  %v589_v14 = vmax.f32 %v487_v7, 0.0 }
 0x1cc   :  { %v592_v13 = vmax.f32 %v498_v9, 0.0 }
 0x1cd   :  { %v590_v15 = vmax.f32 %v490_v11, 0.0 }
 0x1ce   :  { %v618_v16 = vpack.c.bf16 %v592_v13, %v591_v12 }
 0x1cf   :  { %v617_v17 = vpack.c.bf16 %v590_v15, %v589_v14  ;;  %v1058_v18 = vpop.f32.mrb[28].mxu1 }
 0x1d0   :  { %v511_v19 = vadd.f32 %v1058_v18, %v1348_v53  ;;  %v502_v20 = vpop.f32.mrb[29].mxu1 }
 0x1d1   :  { %v503_v21 = vadd.f32 %v1348_v53, %v502_v20  ;;  %v1059_v22 = vpop.f32.mrb[30].mxu1  ;;  %1088 = vmatprep.mubr.msk.bf16.mxu0 %vm371_vm1, %v617_v17 }
 0x1d2   :  { %v514_v24 = vadd.f32 %v1059_v22, %v1348_v53  ;;  %v505_v26 = vpop.f32.mrb[31].mxu1  ;;  %1089 = vmatmul.mubr.msk.bf16.gmra.mrb[24].mxu0 %vm371_vm1, %v618_v16  ;;  %v595_v28 = vmax.f32 %v511_v19, 0.0 }
 0x1d3   :  { %v506_v27 = vadd.f32 %v1348_v53, %v505_v26  ;;  %v593_v30 = vmax.f32 %v503_v21, 0.0 }
 0x1d4   :  { %v596_v29 = vmax.f32 %v514_v24, 0.0 }
 0x1d5   :  { %v594_v31 = vmax.f32 %v506_v27, 0.0  ;;  %v1401_v27 = vld [vmem:[%s1537_s6] ss:$0 sm:$0xff] }
 0x1d6   :  { %v620_v32 = vpack.c.bf16 %v596_v29, %v595_v28 }
 0x1d7   :  { %v619_v33 = vpack.c.bf16 %v594_v31, %v593_v30  ;;  %v1062_v34 = vpop.f32.mrb[32].mxu1 }
 0x1d8   :  { %v527_v35 = vadd.f32 %v1062_v34, %v1348_v53  ;;  %v518_v36 = vpop.f32.mrb[33].mxu1 }
 0x1d9   :  { %v519_v37 = vadd.f32 %v1348_v53, %v518_v36  ;;  %v1063_v38 = vpop.f32.mrb[34].mxu1  ;;  %1092 = vmatprep.mubr.msk.bf16.mxu0 %vm371_vm1, %v619_v33 }
 0x1da   :  { %v530_v39 = vadd.f32 %v1063_v38, %v1348_v53  ;;  %v521_v40 = vpop.f32.mrb[35].mxu1  ;;  %1093 = vmatmul.mubr.msk.bf16.gmra.mrb[28].mxu0 %vm371_vm1, %v620_v32  ;;  %v599_v23 = vmax.f32 %v527_v35, 0.0 }
 0x1db   :  { %v522_v25 = vadd.f32 %v1348_v53, %v521_v40  ;;  %v597_v42 = vmax.f32 %v519_v37, 0.0 }
 0x1dc   :  { %v600_v41 = vmax.f32 %v530_v39, 0.0 }
 0x1dd   :  { %v598_v43 = vmax.f32 %v522_v25, 0.0 }
 0x1de   :  { %v622_v44 = vpack.c.bf16 %v600_v41, %v599_v23 }
 0x1df   :  { %v621_v45 = vpack.c.bf16 %v598_v43, %v597_v42  ;;  %v1066_v46 = vpop.f32.mrb[36].mxu1 }
 0x1e0   :  { %v543_v47 = vadd.f32 %v1066_v46, %v1348_v53  ;;  %v534_v48 = vpop.f32.mrb[37].mxu1 }
 0x1e1   :  { %v535_v49 = vadd.f32 %v1348_v53, %v534_v48  ;;  %v1067_v50 = vpop.f32.mrb[38].mxu1  ;;  %1096 = vmatprep.mubr.msk.bf16.mxu0 %vm371_vm1, %v621_v45 }
 0x1e2   :  { %v546_v51 = vadd.f32 %v1067_v50, %v1348_v53  ;;  %v537_v52 = vpop.f32.mrb[39].mxu1  ;;  %1097 = vmatmul.mubr.msk.bf16.gmra.mrb[32].mxu0 %vm371_vm1, %v622_v44  ;;  %v603_v55 = vmax.f32 %v543_v47, 0.0 }
 0x1e3   :  { %v538_v54 = vadd.f32 %v1348_v53, %v537_v52  ;;  %v601_v57 = vmax.f32 %v535_v49, 0.0 }
 0x1e4   :  { %v604_v56 = vmax.f32 %v546_v51, 0.0 }
 0x1e5   :  { %v602_v58 = vmax.f32 %v538_v54, 0.0 }
 0x1e6   :  { %v624_v59 = vpack.c.bf16 %v604_v56, %v603_v55 }
 0x1e7   :  { %v623_v60 = vpack.c.bf16 %v602_v58, %v601_v57  ;;  %v1070_v61 = vpop.f32.mrb[40].mxu1 }
 0x1e8   :  { %v559_v62 = vadd.f32 %v1070_v61, %v1348_v53  ;;  %v550_v63 = vpop.f32.mrb[41].mxu1 }
 0x1e9   :  { %v551_v0 = vadd.f32 %v1348_v53, %v550_v63  ;;  %v1071_v1 = vpop.f32.mrb[42].mxu1  ;;  %1100 = vmatprep.mubr.msk.bf16.mxu0 %vm371_vm1, %v623_v60 }
 0x1ea   :  { %v562_v2 = vadd.f32 %v1071_v1, %v1348_v53  ;;  %v553_v3 = vpop.f32.mrb[43].mxu1  ;;  %1101 = vmatmul.mubr.msk.bf16.gmra.mrb[36].mxu0 %vm371_vm1, %v624_v59  ;;  %v607_v5 = vmax.f32 %v559_v62, 0.0 }
 0x1eb   :  { %v554_v4 = vadd.f32 %v1348_v53, %v553_v3  ;;  %v605_v7 = vmax.f32 %v551_v0, 0.0 }
 0x1ec   :  { %v608_v6 = vmax.f32 %v562_v2, 0.0 }
 0x1ed   :  { %v606_v8 = vmax.f32 %v554_v4, 0.0 }
 0x1ee   :  { %v626_v9 = vpack.c.bf16 %v608_v6, %v607_v5 }
 0x1ef   :  { %v625_v10 = vpack.c.bf16 %v606_v8, %v605_v7  ;;  %v1074_v11 = vpop.f32.mrb[44].mxu1 }
 0x1f0   :  { %v575_v12 = vadd.f32 %v1074_v11, %v1348_v53  ;;  %v566_v13 = vpop.f32.mrb[45].mxu1 }
 0x1f1   :  { %v567_v14 = vadd.f32 %v1348_v53, %v566_v13  ;;  %v1075_v15 = vpop.f32.mrb[46].mxu1  ;;  %1104 = vmatprep.mubr.msk.bf16.mxu0 %vm371_vm1, %v625_v10 }
 0x1f2   :  { %v578_v16 = vadd.f32 %v1075_v15, %v1348_v53  ;;  %v569_v17 = vpop.f32.mrb[47].mxu1  ;;  %1105 = vmatmul.mubr.msk.bf16.gmra.mrb[40].mxu0 %vm371_vm1, %v626_v9  ;;  %v611_v19 = vmax.f32 %v575_v12, 0.0 }
 0x1f3   :  { %v570_v18 = vadd.f32 %v1348_v53, %v569_v17  ;;  %v609_v21 = vmax.f32 %v567_v14, 0.0 }
 0x1f4   :  { %v612_v20 = vmax.f32 %v578_v16, 0.0 }
 0x1f5   :  { %v610_v22 = vmax.f32 %v570_v18, 0.0 }
 0x1f6   :  { %v628_v24 = vpack.c.bf16 %v612_v20, %v611_v19 }
 0x1f7   :  { %v627_v26 = vpack.c.bf16 %v610_v22, %v609_v21 }
 0x1f9   :  { %1108 = vmatprep.mubr.msk.bf16.mxu0 %vm371_vm1, %v627_v26 }
 0x1fa   :  { %1109 = vmatmul.mubr.msk.bf16.gmra.mrb[44].mxu0 %vm371_vm1, %v628_v24 }
 0x295   :  { %v1082_v28 = vpop.f32.mrb[16].mxu0 }
 0x296   :  { %v743_v29 = vadd.f32 %v1082_v28, %v1401_v27  ;;  %v734_v30 = vpop.f32.mrb[17].mxu0 }
 0x297   :  { %v735_v53 = vadd.f32 %v1401_v27, %v734_v30  ;;  %v1083_v31 = vpop.f32.mrb[18].mxu0 }
 0x298   :  { %863 = vst [vmem:[%s1538_s7 + $0x10] sm:$0xff] %v743_v29  ;;  %v746_v32 = vadd.f32 %v1083_v31, %v1401_v27  ;;  %v737_v33 = vpop.f32.mrb[19].mxu0 }
 0x299   :  { %861 = vst [vmem:[%s1538_s7] sm:$0xff] %v735_v53  ;;  %v738_v34 = vadd.f32 %v1401_v27, %v737_v33 }
 0x29a   :  { %864 = vst [vmem:[%s1538_s7 + $0x18] sm:$0xff] %v746_v32 }
 0x29b   :  { %862 = vst [vmem:[%s1538_s7 + $0x8] sm:$0xff] %v738_v34 }
 0x29d   :  { %v1086_v35 = vpop.f32.mrb[20].mxu0 }
 0x29e   :  { %v759_v36 = vadd.f32 %v1086_v35, %v1401_v27  ;;  %v750_v37 = vpop.f32.mrb[21].mxu0 }
 0x29f   :  { %v751_v38 = vadd.f32 %v1401_v27, %v750_v37  ;;  %v1087_v39 = vpop.f32.mrb[22].mxu0 }
 0x2a0   :  { %867 = vst [vmem:[%s1538_s7 + $0x30] sm:$0xff] %v759_v36  ;;  %v762_v40 = vadd.f32 %v1087_v39, %v1401_v27  ;;  %v753_v25 = vpop.f32.mrb[23].mxu0 }
 0x2a1   :  { %865 = vst [vmem:[%s1538_s7 + $0x20] sm:$0xff] %v751_v38  ;;  %v754_v23 = vadd.f32 %v1401_v27, %v753_v25 }
 0x2a2   :  { %868 = vst [vmem:[%s1538_s7 + $0x38] sm:$0xff] %v762_v40 }
 0x2a3   :  { %866 = vst [vmem:[%s1538_s7 + $0x28] sm:$0xff] %v754_v23 }
 0x2a5   :  { %v1090_v41 = vpop.f32.mrb[24].mxu0 }
 0x2a6   :  { %v775_v42 = vadd.f32 %v1090_v41, %v1401_v27  ;;  %v766_v43 = vpop.f32.mrb[25].mxu0 }
 0x2a7   :  { %v767_v44 = vadd.f32 %v1401_v27, %v766_v43  ;;  %v1091_v45 = vpop.f32.mrb[26].mxu0 }
 0x2a8   :  { %871 = vst [vmem:[%s1538_s7 + $0x50] sm:$0xff] %v775_v42  ;;  %v778_v46 = vadd.f32 %v1091_v45, %v1401_v27  ;;  %v769_v47 = vpop.f32.mrb[27].mxu0 }
 0x2a9   :  { %869 = vst [vmem:[%s1538_s7 + $0x40] sm:$0xff] %v767_v44  ;;  %v770_v48 = vadd.f32 %v1401_v27, %v769_v47 }
 0x2aa   :  { %872 = vst [vmem:[%s1538_s7 + $0x58] sm:$0xff] %v778_v46 }
 0x2ab   :  { %870 = vst [vmem:[%s1538_s7 + $0x48] sm:$0xff] %v770_v48 }
 0x2ad   :  { %v1094_v49 = vpop.f32.mrb[28].mxu0 }
 0x2ae   :  { %v791_v50 = vadd.f32 %v1094_v49, %v1401_v27  ;;  %v782_v51 = vpop.f32.mrb[29].mxu0 }
 0x2af   :  { %v783_v52 = vadd.f32 %v1401_v27, %v782_v51  ;;  %v1095_v54 = vpop.f32.mrb[30].mxu0 }
 0x2b0   :  { %875 = vst [vmem:[%s1538_s7 + $0x70] sm:$0xff] %v791_v50  ;;  %v794_v55 = vadd.f32 %v1095_v54, %v1401_v27  ;;  %v785_v56 = vpop.f32.mrb[31].mxu0 }
 0x2b1   :  { %873 = vst [vmem:[%s1538_s7 + $0x60] sm:$0xff] %v783_v52  ;;  %v786_v57 = vadd.f32 %v1401_v27, %v785_v56 }
 0x2b2   :  { %876 = vst [vmem:[%s1538_s7 + $0x78] sm:$0xff] %v794_v55 }
 0x2b3   :  { %874 = vst [vmem:[%s1538_s7 + $0x68] sm:$0xff] %v786_v57 }
 0x2b5   :  { %v1098_v58 = vpop.f32.mrb[32].mxu0 }
 0x2b6   :  { %v807_v59 = vadd.f32 %v1098_v58, %v1401_v27  ;;  %v798_v60 = vpop.f32.mrb[33].mxu0 }
 0x2b7   :  { %v799_v61 = vadd.f32 %v1401_v27, %v798_v60  ;;  %v1099_v62 = vpop.f32.mrb[34].mxu0 }
 0x2b8   :  { %879 = vst [vmem:[%s1538_s7 + $0x90] sm:$0xff] %v807_v59  ;;  %v810_v63 = vadd.f32 %v1099_v62, %v1401_v27  ;;  %v801_v0 = vpop.f32.mrb[35].mxu0 }
 0x2b9   :  { %877 = vst [vmem:[%s1538_s7 + $0x80] sm:$0xff] %v799_v61  ;;  %v802_v1 = vadd.f32 %v1401_v27, %v801_v0 }
 0x2ba   :  { %880 = vst [vmem:[%s1538_s7 + $0x98] sm:$0xff] %v810_v63 }
 0x2bb   :  { %878 = vst [vmem:[%s1538_s7 + $0x88] sm:$0xff] %v802_v1 }
 0x2bd   :  { %v1102_v2 = vpop.f32.mrb[36].mxu0 }
 0x2be   :  { %v823_v3 = vadd.f32 %v1102_v2, %v1401_v27  ;;  %v814_v4 = vpop.f32.mrb[37].mxu0 }
 0x2bf   :  { %v815_v5 = vadd.f32 %v1401_v27, %v814_v4  ;;  %v1103_v6 = vpop.f32.mrb[38].mxu0 }
 0x2c0   :  { %883 = vst [vmem:[%s1538_s7 + $0xb0] sm:$0xff] %v823_v3  ;;  %v826_v7 = vadd.f32 %v1103_v6, %v1401_v27  ;;  %v817_v8 = vpop.f32.mrb[39].mxu0 }
 0x2c1   :  { %881 = vst [vmem:[%s1538_s7 + $0xa0] sm:$0xff] %v815_v5  ;;  %v818_v9 = vadd.f32 %v1401_v27, %v817_v8 }
 0x2c2   :  { %884 = vst [vmem:[%s1538_s7 + $0xb8] sm:$0xff] %v826_v7 }
 0x2c3   :  { %882 = vst [vmem:[%s1538_s7 + $0xa8] sm:$0xff] %v818_v9 }
 0x2c5   :  { %v1106_v10 = vpop.f32.mrb[40].mxu0 }
 0x2c6   :  { %v839_v11 = vadd.f32 %v1106_v10, %v1401_v27  ;;  %v830_v12 = vpop.f32.mrb[41].mxu0 }
 0x2c7   :  { %v831_v13 = vadd.f32 %v1401_v27, %v830_v12  ;;  %v1107_v14 = vpop.f32.mrb[42].mxu0 }
 0x2c8   :  { %887 = vst [vmem:[%s1538_s7 + $0xd0] sm:$0xff] %v839_v11  ;;  %v842_v15 = vadd.f32 %v1107_v14, %v1401_v27  ;;  %v833_v16 = vpop.f32.mrb[43].mxu0 }
 0x2c9   :  { %885 = vst [vmem:[%s1538_s7 + $0xc0] sm:$0xff] %v831_v13  ;;  %v834_v17 = vadd.f32 %v1401_v27, %v833_v16 }
 0x2ca   :  { %888 = vst [vmem:[%s1538_s7 + $0xd8] sm:$0xff] %v842_v15 }
 0x2cb   :  { %886 = vst [vmem:[%s1538_s7 + $0xc8] sm:$0xff] %v834_v17 }
 0x2cd   :  { %v1110_v18 = vpop.f32.mrb[44].mxu0 }
 0x2ce   :  { %v855_v19 = vadd.f32 %v1110_v18, %v1401_v27  ;;  %v846_v20 = vpop.f32.mrb[45].mxu0 }
 0x2cf   :  { %v847_v21 = vadd.f32 %v1401_v27, %v846_v20  ;;  %v1111_v22 = vpop.f32.mrb[46].mxu0 }
 0x2d0   :  { %891 = vst [vmem:[%s1538_s7 + $0xf0] sm:$0xff] %v855_v19  ;;  %v858_v24 = vadd.f32 %v1111_v22, %v1401_v27  ;;  %v849_v26 = vpop.f32.mrb[47].mxu0 }
 0x2d1   :  { %889 = vst [vmem:[%s1538_s7 + $0xe0] sm:$0xff] %v847_v21  ;;  %v850_v28 = vadd.f32 %v1401_v27, %v849_v26 }
 0x2d2   :  { %892 = vst [vmem:[%s1538_s7 + $0xf8] sm:$0xff] %v858_v24 }
 0x2d3   :  { %890 = vst [vmem:[%s1538_s7 + $0xe8] sm:$0xff] %v850_v28 }

</bundles_post_ra>
